<compile_context>
chip_gen: v5e
topology: v5e:2x2
jax: 0.10.0
libtpu: 0.0.40
codegen_flags: <defaults>
</compile_context>

<pallas_src>
import jax
import jax.numpy as jnp
from jax.experimental import pallas as pl
from jax.experimental.pallas import tpu as pltpu

IN_DIM = 28 * 28      # 784
H1 = 70
H2 = 50
OUT_DIM = 10

# Lane-padded feature dims (multiples of 128) -> dense vreg layout, unmasked vst.
IN_PAD = 896          # 7 * 128
H1_PAD = 128
H2_PAD = 128
OUT_PAD = 128

MAX_TILE_B = 256      # per-step batch tile (multiple of 8 sublanes)


def _mlp_kernel(x_ref, w1_ref, b1_ref, w2_ref, b2_ref, w3_ref, b3_ref, o_ref):
    # dense1 + relu  (bf16 MXU operands, f32 accumulation & elementwise chain)
    x = x_ref[...]
    h1 = jnp.dot(x, w1_ref[...], preferred_element_type=jnp.float32) + b1_ref[...]
    h1 = jnp.maximum(h1, 0.0)
    # dropout1(p=0.25): identity at inference
    # TODO(synk): training-mode dropout would use pltpu.prng_seed/prng_random_bits.

    # dense2 + relu
    h2 = jnp.dot(h1.astype(w2_ref.dtype), w2_ref[...],
                 preferred_element_type=jnp.float32) + b2_ref[...]
    h2 = jnp.maximum(h2, 0.0)
    # dropout2(p=0.25): identity at inference

    # dense3 (logits, no activation)
    out = jnp.dot(h2.astype(w3_ref.dtype), w3_ref[...],
                  preferred_element_type=jnp.float32) + b3_ref[...]
    o_ref[...] = out.astype(o_ref.dtype)


def _pad2(a, rows, cols):
    """Zero-pad a 2-D array to (rows, cols) — zero padding keeps the math exact."""
    return jnp.pad(a, ((0, rows - a.shape[0]), (0, cols - a.shape[1])))


def dense2dropout_forward(x_nchw, params):
    """Forward pass. x_nchw: (B, 1, 28, 28) float32 -> (B, 10) float32."""
    w1, b1, w2, b2, w3, b3 = params
    B = x_nchw.shape[0]

    # glue: flatten like `x.view(-1, 28*28)`
    x = x_nchw.reshape(B, IN_DIM).astype(jnp.float32)

    # Batch tile: multiple of 8 (sublanes), capped at MAX_TILE_B.
    tile_b = min(MAX_TILE_B, ((B + 7) // 8) * 8)
    b_pad = pl.cdiv(B, tile_b) * tile_b

    # Zero-pad batch + feature dims; bf16 matmul operands halve the HBM stream of x.
    x_p = jnp.pad(x, ((0, b_pad - B), (0, IN_PAD - IN_DIM))).astype(jnp.bfloat16)
    w1_p = _pad2(w1, IN_PAD, H1_PAD).astype(jnp.bfloat16)
    w2_p = _pad2(w2, H1_PAD, H2_PAD).astype(jnp.bfloat16)
    w3_p = _pad2(w3, H2_PAD, OUT_PAD).astype(jnp.bfloat16)
    b1_p = _pad2(b1, 1, H1_PAD).astype(jnp.float32)   # biases stay f32
    b2_p = _pad2(b2, 1, H2_PAD).astype(jnp.float32)
    b3_p = _pad2(b3, 1, OUT_PAD).astype(jnp.float32)

    grid = (b_pad // tile_b,)
    const = lambda shape: pl.BlockSpec(shape, lambda i: (0, 0))  # VMEM-resident

    out_p = pl.pallas_call(
        _mlp_kernel,
        out_shape=jax.ShapeDtypeStruct((b_pad, OUT_PAD), jnp.float32),
        grid=grid,
        in_specs=[
            pl.BlockSpec((tile_b, IN_PAD), lambda i: (i, 0)),   # pipelined x tiles
            const((IN_PAD, H1_PAD)), const((1, H1_PAD)),
            const((H1_PAD, H2_PAD)), const((1, H2_PAD)),
            const((H2_PAD, OUT_PAD)), const((1, OUT_PAD)),
        ],
        out_specs=pl.BlockSpec((tile_b, OUT_PAD), lambda i: (i, 0)),
        compiler_params=pltpu.CompilerParams(
            dimension_semantics=("parallel",),     # dual-TC sharding on v7x
            vmem_limit_bytes=8 << 20,              # real need is ~2 MiB/step
        ),
    )(x_p, w1_p, b1_p, w2_p, b2_p, w3_p, b3_p)

    # Slice padded batch rows / padded logit lanes back off.
    return out_p[:B, :OUT_DIM]


def init_params(key):
    """Deterministic PyTorch-style uniform(-1/sqrt(fan_in), 1/sqrt(fan_in)) init."""
    ks = jax.random.split(key, 6)

    def lin(kw, kb, fan_in, fan_out):
        bound = 1.0 / jnp.sqrt(float(fan_in))
        # stored as (in, out) so the kernel does x @ W (equivalent to torch x @ W.T)
        w = jax.random.uniform(kw, (fan_in, fan_out), jnp.float32, -bound, bound)
        b = jax.random.uniform(kb, (1, fan_out), jnp.float32, -bound, bound)
        return w, b

    w1, b1 = lin(ks[0], ks[1], IN_DIM, H1)
    w2, b2 = lin(ks[2], ks[3], H1, H2)
    w3, b3 = lin(ks[4], ks[5], H2, OUT_DIM)
    return (w1, b1, w2, b2, w3, b3)


if __name__ == "__main__":
    key = jax.random.PRNGKey(0)
    k_param, k_x = jax.random.split(key)

    params = init_params(k_param)
    # small MNIST-like batch, NCHW
    x = jax.random.normal(k_x, (2, 1, 28, 28), dtype=jnp.float32)

    out = dense2dropout_forward(x, params)
    out = jax.block_until_ready(out)

    # reference check (pure JAX f32, eval-mode dropout = identity);
    # loose tolerance because the kernel uses bf16 matmul operands.
    w1, b1, w2, b2, w3, b3 = params
    xr = x.reshape(2, IN_DIM)
    h1 = jnp.maximum(xr @ w1 + b1, 0.0)
    h2 = jnp.maximum(h1 @ w2 + b2, 0.0)
    ref = h2 @ w3 + b3
    assert out.shape == (2, OUT_DIM)
    assert jnp.allclose(out, ref, atol=5e-2, rtol=5e-2), (
        f"max abs err {jnp.max(jnp.abs(out - ref)):.4f}")

    print("KERNEL_OK")
</pallas_src>

<mosaic_0001>
module attributes {stable_mosaic.version = 11 : i64} {
  func.func @_mlp_kernel(%arg0: i32, %arg1: memref<8x896xbf16, #tpu.memory_space<vmem>>, %arg2: memref<896x128xbf16, #tpu.memory_space<vmem>>, %arg3: memref<1x128xf32, #tpu.memory_space<vmem>>, %arg4: memref<128x128xbf16, #tpu.memory_space<vmem>>, %arg5: memref<1x128xf32, #tpu.memory_space<vmem>>, %arg6: memref<128x128xbf16, #tpu.memory_space<vmem>>, %arg7: memref<1x128xf32, #tpu.memory_space<vmem>>, %arg8: memref<8x128xf32, #tpu.memory_space<vmem>>) attributes {dimension_semantics = [#tpu.dimension_semantics<parallel>], iteration_bounds = array<i64: 1>, scalar_prefetch = 0 : i64, scratch_operands = 0 : i64, tpu.core_type = #tpu.core_type<tc>, window_params = [{transform_indices = @transform_0, window_bounds = array<i64: 8, 896>}, {pipeline_mode = #tpu.pipeline_mode<synchronous>, transform_indices = @transform_1, window_bounds = array<i64: 896, 128>}, {pipeline_mode = #tpu.pipeline_mode<synchronous>, transform_indices = @transform_2, window_bounds = array<i64: 1, 128>}, {pipeline_mode = #tpu.pipeline_mode<synchronous>, transform_indices = @transform_3, window_bounds = array<i64: 128, 128>}, {pipeline_mode = #tpu.pipeline_mode<synchronous>, transform_indices = @transform_4, window_bounds = array<i64: 1, 128>}, {pipeline_mode = #tpu.pipeline_mode<synchronous>, transform_indices = @transform_5, window_bounds = array<i64: 128, 128>}, {pipeline_mode = #tpu.pipeline_mode<synchronous>, transform_indices = @transform_6, window_bounds = array<i64: 1, 128>}, {transform_indices = @transform_7, window_bounds = array<i64: 8, 128>}]} {
    %c0 = arith.constant 0 : index
    %c0_0 = arith.constant 0 : index
    %0 = vector.load %arg1[%c0, %c0_0] : memref<8x896xbf16, #tpu.memory_space<vmem>>, vector<8x896xbf16>
    %c0_1 = arith.constant 0 : index
    %c0_2 = arith.constant 0 : index
    %1 = vector.load %arg2[%c0_1, %c0_2] : memref<896x128xbf16, #tpu.memory_space<vmem>>, vector<896x128xbf16>
    %cst = arith.constant dense<0.000000e+00> : vector<8x128xf32>
    %2 = tpu.matmul %0, %1, %cst {dimension_numbers = #tpu.dot_dimension_numbers<[1], [0], [0], [1], [0, 0, 1, 1], [], []>} : vector<8x896xbf16>, vector<896x128xbf16>, vector<8x128xf32> -> vector<8x128xf32>
    %c0_3 = arith.constant 0 : index
    %c0_4 = arith.constant 0 : index
    %3 = vector.load %arg3[%c0_3, %c0_4] : memref<1x128xf32, #tpu.memory_space<vmem>>, vector<1x128xf32>
    %4 = vector.broadcast %3 : vector<1x128xf32> to vector<8x128xf32>
    %5 = arith.addf %2, %4 : vector<8x128xf32>
    %cst_5 = arith.constant 0.000000e+00 : f32
    %6 = vector.broadcast %cst_5 : f32 to vector<8x128xf32>
    %7 = arith.maximumf %5, %6 : vector<8x128xf32>
    %8 = arith.truncf %7 : vector<8x128xf32> to vector<8x128xbf16>
    %c0_6 = arith.constant 0 : index
    %c0_7 = arith.constant 0 : index
    %9 = vector.load %arg4[%c0_6, %c0_7] : memref<128x128xbf16, #tpu.memory_space<vmem>>, vector<128x128xbf16>
    %cst_8 = arith.constant dense<0.000000e+00> : vector<8x128xf32>
    %10 = tpu.matmul %8, %9, %cst_8 {dimension_numbers = #tpu.dot_dimension_numbers<[1], [0], [0], [1], [0, 0, 1, 1], [], []>} : vector<8x128xbf16>, vector<128x128xbf16>, vector<8x128xf32> -> vector<8x128xf32>
    %c0_9 = arith.constant 0 : index
    %c0_10 = arith.constant 0 : index
    %11 = vector.load %arg5[%c0_9, %c0_10] : memref<1x128xf32, #tpu.memory_space<vmem>>, vector<1x128xf32>
    %12 = vector.broadcast %11 : vector<1x128xf32> to vector<8x128xf32>
    %13 = arith.addf %10, %12 : vector<8x128xf32>
    %cst_11 = arith.constant 0.000000e+00 : f32
    %14 = vector.broadcast %cst_11 : f32 to vector<8x128xf32>
    %15 = arith.maximumf %13, %14 : vector<8x128xf32>
    %16 = arith.truncf %15 : vector<8x128xf32> to vector<8x128xbf16>
    %c0_12 = arith.constant 0 : index
    %c0_13 = arith.constant 0 : index
    %17 = vector.load %arg6[%c0_12, %c0_13] : memref<128x128xbf16, #tpu.memory_space<vmem>>, vector<128x128xbf16>
    %cst_14 = arith.constant dense<0.000000e+00> : vector<8x128xf32>
    %18 = tpu.matmul %16, %17, %cst_14 {dimension_numbers = #tpu.dot_dimension_numbers<[1], [0], [0], [1], [0, 0, 1, 1], [], []>} : vector<8x128xbf16>, vector<128x128xbf16>, vector<8x128xf32> -> vector<8x128xf32>
    %c0_15 = arith.constant 0 : index
    %c0_16 = arith.constant 0 : index
    %19 = vector.load %arg7[%c0_15, %c0_16] : memref<1x128xf32, #tpu.memory_space<vmem>>, vector<1x128xf32>
    %20 = vector.broadcast %19 : vector<1x128xf32> to vector<8x128xf32>
    %21 = arith.addf %18, %20 : vector<8x128xf32>
    %c0_17 = arith.constant 0 : index
    %c0_18 = arith.constant 0 : index
    %22 = vector.load %arg8[%c0_17, %c0_18] : memref<8x128xf32, #tpu.memory_space<vmem>>, vector<8x128xf32>
    tpu.vector_store %arg8[%c0_17, %c0_18], %21 {strides = array<i32>} : memref<8x128xf32, #tpu.memory_space<vmem>>, vector<8x128xf32>,
    return
  }
  func.func @transform_0(%arg0: i32) -> (i32, i32) {
    %c0_i32 = arith.constant 0 : i32
    %c0_i32_0 = arith.constant 0 : i32
    return %arg0, %c0_i32 : i32, i32
  }
  func.func @transform_1(%arg0: i32) -> (i32, i32) {
    %c0_i32 = arith.constant 0 : i32
    %c0_i32_0 = arith.constant 0 : i32
    %c0_i32_1 = arith.constant 0 : i32
    return %c0_i32, %c0_i32_0 : i32, i32
  }
  func.func @transform_2(%arg0: i32) -> (i32, i32) {
    %c0_i32 = arith.constant 0 : i32
    %c0_i32_0 = arith.constant 0 : i32
    %c0_i32_1 = arith.constant 0 : i32
    return %c0_i32, %c0_i32_0 : i32, i32
  }
  func.func @transform_3(%arg0: i32) -> (i32, i32) {
    %c0_i32 = arith.constant 0 : i32
    %c0_i32_0 = arith.constant 0 : i32
    %c0_i32_1 = arith.constant 0 : i32
    return %c0_i32, %c0_i32_0 : i32, i32
  }
  func.func @transform_4(%arg0: i32) -> (i32, i32) {
    %c0_i32 = arith.constant 0 : i32
    %c0_i32_0 = arith.constant 0 : i32
    %c0_i32_1 = arith.constant 0 : i32
    return %c0_i32, %c0_i32_0 : i32, i32
  }
  func.func @transform_5(%arg0: i32) -> (i32, i32) {
    %c0_i32 = arith.constant 0 : i32
    %c0_i32_0 = arith.constant 0 : i32
    %c0_i32_1 = arith.constant 0 : i32
    return %c0_i32, %c0_i32_0 : i32, i32
  }
  func.func @transform_6(%arg0: i32) -> (i32, i32) {
    %c0_i32 = arith.constant 0 : i32
    %c0_i32_0 = arith.constant 0 : i32
    %c0_i32_1 = arith.constant 0 : i32
    return %c0_i32, %c0_i32_0 : i32, i32
  }
  func.func @transform_7(%arg0: i32) -> (i32, i32) {
    %c0_i32 = arith.constant 0 : i32
    %c0_i32_0 = arith.constant 0 : i32
    return %arg0, %c0_i32 : i32, i32
  }
}

</mosaic_0001>

<bundles_post_ra>
// kernel: tpu_custom_call.1
= control target key start
LH: loop header
LB: loop body
LE: loop exit
PB: predicated region body
PF: predicated region fallthrough
CT: control target
= control target key end

     0   :  { %12 = vsyncpa [#allocation3], 0  ;;  %s1415_s0 = inlined_call_operand.hbm [shape: bf16[8,896], index: 0, kind: input, shape index: {}]   ;;  %s1416_s1 = inlined_call_operand.hbm [shape: bf16[896,128], index: 1, kind: input, shape index: {}]   ;;  %s1417_s2 = inlined_call_operand.vmem [shape: f32[1,128], index: 2, kind: input, shape index: {}]   ;;  %s1418_s3 = inlined_call_operand.hbm [shape: bf16[128,128], index: 3, kind: input, shape index: {}]   ;;  %s1419_s4 = inlined_call_operand.vmem [shape: f32[1,128], index: 4, kind: input, shape index: {}]   ;;  %s1420_s5 = inlined_call_operand.hbm [shape: bf16[128,128], index: 5, kind: input, shape index: {}]   ;;  %s1421_s6 = inlined_call_operand.vmem [shape: f32[1,128], index: 6, kind: input, shape index: {}]   ;;  %s1422_s7 = inlined_call_operand.hbm [shape: f32[8,128], index: 7, kind: output, shape index: {}]  }
   0x1   :  { %13 = vsyncpa [#allocation6], 0 }
   0x2   :  { %14 = vsyncpa [#allocation9], 0  ;;  %s31_s26 = sshll.u32 %s1416_s1, 4  ;;  %s32_s26 = int_to_ptr.hbm [resolvable:$true] %s31_s26 }
   0x3   :  { %15 = vsyncpa [#allocation4], 0  ;;  %s1344_s27 = smov [#allocation5]   ;;  %s21_s8 = sshll.u32 %s1415_s0, 4  ;;  %s22_s8 = int_to_ptr.hbm [resolvable:$true] %s21_s8 }
   0x4   :  { %s33_s28 = sshll.u32 %s1344_s27, 4  ;;  %s1345_s9 = smov 64   ;;  %s34_s28 = int_to_ptr.vmem [resolvable:$true] %s33_s28 }
   0x5   :  { %s1346_s10 = smov 4   ;;  %s1347_s11 = smov [#allocation2]  }
   0x6   :  { %39 = dma.hbm_to_vmem [thread:$0]  %s32_s26, 7168, %s34_s28, [#allocation6], %s1345_s9, %s1345_s9, %s1346_s10  }
   0x7   :  { %s23_s12 = sshll.u32 %s1347_s11, 4  ;;  %s46_s15 = sshll.u32 %s1418_s3, 4  ;;  %s24_s12 = int_to_ptr.vmem [resolvable:$true] %s23_s12  ;;  %s47_s15 = int_to_ptr.hbm [resolvable:$true] %s46_s15 }
   0x8   :  { %26 = dma.hbm_to_vmem [thread:$0]  %s22_s8, 448, %s24_s12, [#allocation3]  }
   0x9   :  { %s61_s17 = sshll.u32 %s1420_s5, 4  ;;  %s1348_s18 = smov [#allocation7]   ;;  %s62_s17 = int_to_ptr.hbm [resolvable:$true] %s61_s17 }
   0xa   :  { %s48_s19 = sshll.u32 %s1348_s18, 4  ;;  %s1349_s0 = smov [#allocation8]   ;;  %s49_s19 = int_to_ptr.vmem [resolvable:$true] %s48_s19 }
   0xb   :  { %54 = dma.hbm_to_vmem [thread:$0]  %s47_s15, 1024, %s49_s19, [#allocation6], %s1345_s9, %s1345_s9, %s1346_s10  }
   0xc   :  { %s63_s20 = sshll.u32 %s1349_s0, 4  ;;  %s64_s20 = int_to_ptr.vmem [resolvable:$true] %s63_s20 }
   0xd   :  { %69 = dma.hbm_to_vmem [thread:$0]  %s62_s17, 1024, %s64_s20, [#allocation9], %s1345_s9, %s1345_s9, %s1346_s10  }
   0xe   :  { %1336 = dma.done.wait [#allocation3], 448  }
   0xf   :  { %1337 = vsyncadd [#allocation3], 4294966848 }
  0x10   :  { %1338 = dma.done.wait [#allocation6], 8192  }
  0x11   :  { %1339 = vsyncadd [#allocation6], 4294959104 }
  0x12   :  { %1340 = dma.done.wait [#allocation9], 1024  }
  0x13   :  { %1341 = vsyncadd [#allocation9], 4294966272  ;;  %v1141_v0 = vld [vmem:[#allocation5 + $0x38] sm:$0xff]  ;;  %v1140_v3 = vld [vmem:[#allocation5 + $0x30] sm:$0xff]  ;;  %s1350_s24 = smov [#allocation10]   ;;  %s834_s28 = sshll.u32 %s1422_s7, 4  ;;  %s835_s28 = int_to_ptr.hbm [resolvable:$true] %s834_s28 }
  0x14   :  { %v1149_v1 = vld [vmem:[#allocation5 + $0x78] sm:$0xff]  ;;  %569 = vmatpush.bf16.msra.mxu0 %v1141_v0  ;;  %v1148_v4 = vld [vmem:[#allocation5 + $0x70] sm:$0xff]  ;;  %v1139_v7 = vld [vmem:[#allocation5 + $0x28] sm:$0xff]  ;;  %s832_s25 = sshll.u32 %s1350_s24, 4  ;;  %s833_s25 = int_to_ptr.vmem [resolvable:$true] %s832_s25 }
  0x15   :  { %v1157_v2 = vld [vmem:[#allocation5 + $0xb8] sm:$0xff]  ;;  %582 = vmatpush.bf16.msra.mxu1 %v1149_v1  ;;  %v1156_v5 = vld [vmem:[#allocation5 + $0xb0] sm:$0xff]  ;;  %v1147_v8 = vld [vmem:[#allocation5 + $0x68] sm:$0xff] }
  0x16   :  { %595 = vmatpush.bf16.msra.mxu2 %v1157_v2  ;;  %v1165_v6 = vld [vmem:[#allocation5 + $0xf8] sm:$0xff]  ;;  %v1155_v9 = vld [vmem:[#allocation5 + $0xa8] sm:$0xff]  ;;  %v1164_v10 = vld [vmem:[#allocation5 + $0xf0] sm:$0xff] }
  0x17   :  { %608 = vmatpush.bf16.msra.mxu3 %v1165_v6  ;;  %v1138_v11 = vld [vmem:[#allocation5 + $0x20] sm:$0xff]  ;;  %v1163_v14 = vld [vmem:[#allocation5 + $0xe8] sm:$0xff]  ;;  %v1137_v15 = vld [vmem:[#allocation5 + $0x18] sm:$0xff] }
  0x18   :  { %570 = vmatpush.bf16.msra.mxu0 %v1140_v3  ;;  %v1146_v12 = vld [vmem:[#allocation5 + $0x60] sm:$0xff]  ;;  %v1145_v16 = vld [vmem:[#allocation5 + $0x58] sm:$0xff]  ;;  %v1136_v19 = vld [vmem:[#allocation5 + $0x10] sm:$0xff] }
  0x19   :  { %583 = vmatpush.bf16.msra.mxu1 %v1148_v4  ;;  %v1154_v13 = vld [vmem:[#allocation5 + $0xa0] sm:$0xff]  ;;  %v1153_v17 = vld [vmem:[#allocation5 + $0x98] sm:$0xff]  ;;  %v1144_v20 = vld [vmem:[#allocation5 + $0x50] sm:$0xff] }
  0x1a   :  { %596 = vmatpush.bf16.msra.mxu2 %v1156_v5  ;;  %v1162_v18 = vld [vmem:[#allocation5 + $0xe0] sm:$0xff]  ;;  %v1152_v21 = vld [vmem:[#allocation5 + $0x90] sm:$0xff]  ;;  %v1161_v22 = vld [vmem:[#allocation5 + $0xd8] sm:$0xff] }
  0x1b   :  { %609 = vmatpush.bf16.msra.mxu3 %v1164_v10  ;;  %v1135_v23 = vld [vmem:[#allocation5 + $0x8] sm:$0xff]  ;;  %v1160_v27 = vld [vmem:[#allocation5 + $0xd0] sm:$0xff]  ;;  %v1134_v30 = vld [vmem:[#allocation5] sm:$0xff] }
  0x1c   :  { %571 = vmatpush.bf16.msra.mxu0 %v1139_v7  ;;  %v1143_v24 = vld [vmem:[#allocation5 + $0x48] sm:$0xff]  ;;  %v1142_v31 = vld [vmem:[#allocation5 + $0x40] sm:$0xff]  ;;  %v1173_v35 = vld [vmem:[#allocation5 + $0x138] sm:$0xff] }
  0x1d   :  { %584 = vmatpush.bf16.msra.mxu1 %v1147_v8  ;;  %v88_v25 = vld [vmem:[#allocation2] sm:$0xff]  ;;  %v89_v28 = vld [vmem:[#allocation2 + $0x8] sm:$0xff]  ;;  %v1181_v36 = vld [vmem:[#allocation5 + $0x178] sm:$0xff] }
  0x1e   :  { %597 = vmatpush.bf16.msra.mxu2 %v1155_v9  ;;  %v1151_v26 = vld [vmem:[#allocation5 + $0x88] sm:$0xff]  ;;  %v212_v29 = vunpack.c.l.b16 %v88_v25  ;;  %v214_v32 = vunpack.c.l.b16 %v89_v28  ;;  %v213_v33 = vunpack.c.h.b16 %v88_v25  ;;  %v1150_v34 = vld [vmem:[#allocation5 + $0x80] sm:$0xff]  ;;  %v1189_v37 = vld [vmem:[#allocation5 + $0x1b8] sm:$0xff]  ;;  %v215_v46 = vunpack.c.h.b16 %v89_v28 }
  0x1f   :  { %610 = vmatpush.bf16.msra.mxu3 %v1163_v14  ;;  %v1159_v39 = vld [vmem:[#allocation5 + $0xc8] sm:$0xff]  ;;  %v1172_v42 = vld [vmem:[#allocation5 + $0x130] sm:$0xff]  ;;  %v1158_v45 = vld [vmem:[#allocation5 + $0xc0] sm:$0xff] }
  0x20   :  { %572 = vmatpush.bf16.msra.mxu0 %v1138_v11  ;;  %v219_v38 = vpack.c.b16 %v212_v29, %v212_v29  ;;  %v221_v40 = vpack.c.b16 %v214_v32, %v214_v32  ;;  %v220_v41 = vpack.c.b16 %v213_v33, %v213_v33  ;;  %v1180_v43 = vld [vmem:[#allocation5 + $0x170] sm:$0xff]  ;;  %v1171_v47 = vld [vmem:[#allocation5 + $0x128] sm:$0xff]  ;;  %v222_v50 = vpack.c.b16 %v215_v46, %v215_v46  ;;  %v1170_v51 = vld [vmem:[#allocation5 + $0x120] sm:$0xff] }
  0x21   :  { %585 = vmatpush.bf16.msra.mxu1 %v1146_v12  ;;  %v1188_v44 = vld [vmem:[#allocation5 + $0x1b0] sm:$0xff]  ;;  %v1179_v48 = vld [vmem:[#allocation5 + $0x168] sm:$0xff]  ;;  %v1178_v52 = vld [vmem:[#allocation5 + $0x160] sm:$0xff] }
  0x22   :  { %598 = vmatpush.bf16.msra.mxu2 %v1154_v13  ;;  %v1187_v49 = vld [vmem:[#allocation5 + $0x1a8] sm:$0xff]  ;;  %v1186_v53 = vld [vmem:[#allocation5 + $0x1a0] sm:$0xff]  ;;  %v1169_v54 = vld [vmem:[#allocation5 + $0x118] sm:$0xff] }
  0x23   :  { %611 = vmatpush.bf16.msra.mxu3 %v1162_v18  ;;  %v1177_v55 = vld [vmem:[#allocation5 + $0x158] sm:$0xff]  ;;  %v1168_v57 = vld [vmem:[#allocation5 + $0x110] sm:$0xff]  ;;  %v1167_v60 = vld [vmem:[#allocation5 + $0x108] sm:$0xff] }
  0x24   :  { %573 = vmatpush.bf16.msra.mxu0 %v1137_v15  ;;  %v1185_v56 = vld [vmem:[#allocation5 + $0x198] sm:$0xff]  ;;  %v1176_v58 = vld [vmem:[#allocation5 + $0x150] sm:$0xff]  ;;  %v1175_v62 = vld [vmem:[#allocation5 + $0x148] sm:$0xff] }
  0x25   :  { %586 = vmatpush.bf16.msra.mxu1 %v1145_v16  ;;  %v1184_v59 = vld [vmem:[#allocation5 + $0x190] sm:$0xff]  ;;  %v1183_v63 = vld [vmem:[#allocation5 + $0x188] sm:$0xff]  ;;  %v91_v0 = vld [vmem:[#allocation2 + $0x18] sm:$0xf] }
  0x26   :  { %599 = vmatpush.bf16.msra.mxu2 %v1153_v17  ;;  %v90_v61 = vld [vmem:[#allocation2 + $0x10] sm:$0xff]  ;;  %v1166_v2 = vld [vmem:[#allocation5 + $0x100] sm:$0xff]  ;;  %v218_v4 = vunpack.c.l.b16 %v91_v0  ;;  %v1195_v12 = vld [vmem:[#allocation7 + $0x28] sm:$0xff] }
  0x27   :  { %612 = vmatpush.bf16.msra.mxu3 %v1161_v22  ;;  %v216_v1 = vunpack.c.l.b16 %v90_v61  ;;  %v217_v3 = vunpack.c.h.b16 %v90_v61  ;;  %v1174_v5 = vld [vmem:[#allocation5 + $0x140] sm:$0xff]  ;;  %v1197_v10 = vld [vmem:[#allocation7 + $0x38] sm:$0xff]  ;;  %v1196_v11 = vld [vmem:[#allocation7 + $0x30] sm:$0xff] }
  0x28   :  { %574 = vmatpush.bf16.msra.mxu0 %v1136_v19  ;;  %v1182_v6 = vld [vmem:[#allocation5 + $0x180] sm:$0xff]  ;;  %v225_v9 = vpack.c.b16 %v218_v4, %v218_v4  ;;  %v1193_v14 = vld [vmem:[#allocation7 + $0x18] sm:$0xff]  ;;  %v1192_v15 = vld [vmem:[#allocation7 + $0x10] sm:$0xff] }
  0x29   :  { %587 = vmatpush.bf16.msra.mxu1 %v1144_v20  ;;  %v223_v7 = vpack.c.b16 %v216_v1, %v216_v1  ;;  %v224_v8 = vpack.c.b16 %v217_v3, %v217_v3  ;;  %v1194_v13 = vld [vmem:[#allocation7 + $0x20] sm:$0xff]  ;;  %v1191_v18 = vld [vmem:[#allocation7 + $0x8] sm:$0xff] }
  0x2a   :  { %600 = vmatpush.bf16.msra.mxu2 %v1152_v21  ;;  %v1190_v19 = vld [vmem:[#allocation7] sm:$0xff]  ;;  %v1203_v29 = vld [vmem:[#allocation8 + $0x28] sm:$0xff] }
  0x2b   :  { %613 = vmatpush.bf16.msra.mxu3 %v1160_v27  ;;  %v1202_v32 = vld [vmem:[#allocation8 + $0x20] sm:$0xff] }
  0x2c   :  { %575 = vmatpush.bf16.msra.mxu0 %v1135_v23  ;;  %v1205_v23 = vld [vmem:[#allocation8 + $0x38] sm:$0xff] }
  0x2d   :  { %588 = vmatpush.bf16.msra.mxu1 %v1143_v24  ;;  %v1213_v24 = vld [vmem:[%s1417_s2] ss:$0 sm:$0xff] }
  0x2e   :  { %601 = vmatpush.bf16.msra.mxu2 %v1151_v26  ;;  %v1204_v26 = vld [vmem:[#allocation8 + $0x30] sm:$0xff] }
  0x2f   :  { %614 = vmatpush.bf16.msra.mxu3 %v1159_v39 }
  0x30   :  { %576 = vmatpush.bf16.msra.mxu0 %v1134_v30 }
  0x31   :  { %589 = vmatpush.bf16.msra.mxu1 %v1142_v31 }
  0x32   :  { %602 = vmatpush.bf16.msra.mxu2 %v1150_v34  ;;  %v1201_v34 = vld [vmem:[#allocation8 + $0x18] sm:$0xff] }
  0x33   :  { %577 = vmatmul.bf16.vlgmr.msra.gmra.mxu0 %v219_v38  ;;  %615 = vmatpush.bf16.msra.mxu3 %v1158_v45  ;;  %v1200_v38 = vld [vmem:[#allocation8 + $0x10] sm:$0xff] }
  0x34   :  { %621 = vmatpush.bf16.msrb.mxu0 %v1173_v35  ;;  %590 = vmatmul.bf16.vlgmr.msra.gmra.mxu1 %v220_v41 }
  0x35   :  { %634 = vmatpush.bf16.msrb.mxu1 %v1181_v36  ;;  %603 = vmatmul.bf16.vlgmr.msra.gmra.mxu2 %v221_v40 }
  0x36   :  { %647 = vmatpush.bf16.msrb.mxu2 %v1189_v37  ;;  %616 = vmatmul.bf16.vlgmr.msra.gmra.mxu3 %v222_v50  ;;  %v1214_v50 = vld [vmem:[%s1419_s4] ss:$0 sm:$0xff] }
  0x37   :  { %730 = vmatpush.bf16.msrb.mxu3 %v1197_v10 }
  0x38   :  { %622 = vmatpush.bf16.msrb.mxu0 %v1172_v42 }
  0x39   :  { %635 = vmatpush.bf16.msrb.mxu1 %v1180_v43 }
  0x3a   :  { %648 = vmatpush.bf16.msrb.mxu2 %v1188_v44 }
  0x3b   :  { %731 = vmatpush.bf16.msrb.mxu3 %v1196_v11 }
  0x3c   :  { %623 = vmatpush.bf16.msrb.mxu0 %v1171_v47 }
  0x3d   :  { %636 = vmatpush.bf16.msrb.mxu1 %v1179_v48  ;;  %v1199_v48 = vld [vmem:[#allocation8 + $0x8] sm:$0xff] }
  0x3e   :  { %649 = vmatpush.bf16.msrb.mxu2 %v1187_v49  ;;  %v1198_v49 = vld [vmem:[#allocation8] sm:$0xff] }
  0x3f   :  { %732 = vmatpush.bf16.msrb.mxu3 %v1195_v12 }
  0x40   :  { %624 = vmatpush.bf16.msrb.mxu0 %v1170_v51 }
  0x41   :  { %637 = vmatpush.bf16.msrb.mxu1 %v1178_v52 }
  0x42   :  { %650 = vmatpush.bf16.msrb.mxu2 %v1186_v53 }
  0x43   :  { %733 = vmatpush.bf16.msrb.mxu3 %v1194_v13 }
  0x44   :  { %625 = vmatpush.bf16.msrb.mxu0 %v1169_v54 }
  0x45   :  { %638 = vmatpush.bf16.msrb.mxu1 %v1177_v55 }
  0x46   :  { %651 = vmatpush.bf16.msrb.mxu2 %v1185_v56  ;;  %v1215_v56 = vld [vmem:[%s1421_s6] ss:$0 sm:$0xff] }
  0x47   :  { %734 = vmatpush.bf16.msrb.mxu3 %v1193_v14 }
  0x48   :  { %626 = vmatpush.bf16.msrb.mxu0 %v1168_v57 }
  0x49   :  { %639 = vmatpush.bf16.msrb.mxu1 %v1176_v58 }
  0x4a   :  { %652 = vmatpush.bf16.msrb.mxu2 %v1184_v59 }
  0x4b   :  { %735 = vmatpush.bf16.msrb.mxu3 %v1192_v15 }
  0x4c   :  { %627 = vmatpush.bf16.msrb.mxu0 %v1167_v60 }
  0x4d   :  { %640 = vmatpush.bf16.msrb.mxu1 %v1175_v62 }
  0x4e   :  { %653 = vmatpush.bf16.msrb.mxu2 %v1183_v63 }
  0x4f   :  { %736 = vmatpush.bf16.msrb.mxu3 %v1191_v18 }
  0x50   :  { %628 = vmatpush.bf16.msrb.mxu0 %v1166_v2 }
  0x51   :  { %641 = vmatpush.bf16.msrb.mxu1 %v1174_v5 }
  0x52   :  { %654 = vmatpush.bf16.msrb.mxu2 %v1182_v6 }
  0x53   :  { %629 = vmatmul.bf16.vlgmr.msrb.gmra.mxu0 %v223_v7  ;;  %737 = vmatpush.bf16.msrb.mxu3 %v1190_v19 }
  0x54   :  { %642 = vmatmul.bf16.vlgmr.msrb.gmra.mxu1 %v224_v8  ;;  %813 = vmatpush.bf16.msra.mxu0 %v1205_v23 }
  0x55   :  { %655 = vmatmul.bf16.vlgmr.msrb.gmra.mxu2 %v225_v9 }
  0x58   :  { %814 = vmatpush.bf16.msra.mxu0 %v1204_v26 }
  0x5c   :  { %815 = vmatpush.bf16.msra.mxu0 %v1203_v29 }
  0x60   :  { %816 = vmatpush.bf16.msra.mxu0 %v1202_v32 }
  0x64   :  { %817 = vmatpush.bf16.msra.mxu0 %v1201_v34 }
  0x68   :  { %818 = vmatpush.bf16.msra.mxu0 %v1200_v38 }
  0x6c   :  { %819 = vmatpush.bf16.msra.mxu0 %v1199_v48 }
  0x70   :  { %820 = vmatpush.bf16.msra.mxu0 %v1198_v49 }
  0xb0   :  { %v578_v16 = vpop.f32.mrf.mxu0 }
  0xb1   :  { %v591_v17 = vpop.f32.mrf.mxu1  ;;  %v579_v28 = vadd.f32 %v1213_v24, %v578_v16 }
  0xb3   :  { %v592_v30 = vadd.f32 %v591_v17, %v579_v28 }
  0xb8   :  { %v604_v20 = vpop.f32.mrf.mxu2  ;;  %v580_v21 = vpop.f32.mrf.mxu0 }
  0xb9   :  { %v593_v22 = vpop.f32.mrf.mxu1  ;;  %v617_v25 = vpop.f32.mrf.mxu3  ;;  %v605_v33 = vadd.f32 %v604_v20, %v592_v30 }
  0xbb   :  { %v618_v35 = vadd.f32 %v617_v25, %v605_v33 }
  0xc0   :  { %v606_v27 = vpop.f32.mrf.mxu2 }
  0xc1   :  { %v619_v31 = vpop.f32.mrf.mxu3 }
  0xd0   :  { %v630_v36 = vpop.f32.mrf.mxu0 }
  0xd1   :  { %v643_v37 = vpop.f32.mrf.mxu1  ;;  %v631_v39 = vadd.f32 %v630_v36, %v618_v35 }
  0xd3   :  { %v644_v40 = vadd.f32 %v643_v37, %v631_v39 }
  0xd8   :  { %v656_v41 = vpop.f32.mrf.mxu2  ;;  %v632_v43 = vpop.f32.mrf.mxu0 }
  0xd9   :  { %v657_v42 = vadd.f32 %v656_v41, %v644_v40  ;;  %v645_v44 = vpop.f32.mrf.mxu1 }
  0xdb   :  { %v660_v45 = vmax.f32 %v657_v42, 0.0 }
  0xdd   :  { %v661_v46 = vpack.c.bf16 %v660_v45, %v660_v45 }
  0xdf   :  { %738 = vmatmul.bf16.vlgmr.msrb.gmra.mxu3 %v661_v46 }
  0xe0   :  { %v658_v47 = vpop.f32.mrf.mxu2 }
 0x162   :  { %v739_v51 = vpop.f32.mrf.mxu3 }
 0x163   :  { %v740_v52 = vadd.f32 %v1214_v50, %v739_v51 }
 0x165   :  { %v743_v53 = vmax.f32 %v740_v52, 0.0 }
 0x167   :  { %v744_v54 = vpack.c.bf16 %v743_v53, %v743_v53 }
 0x169   :  { %821 = vmatmul.bf16.vlgmr.msra.gmra.mxu0 %v744_v54 }
 0x16a   :  { %v741_v55 = vpop.f32.mrf.mxu3 }
 0x1e6   :  { %v822_v57 = vpop.f32.mrf.mxu0 }
 0x1e7   :  { %v823_v58 = vadd.f32 %v1215_v56, %v822_v57 }
 0x1e9   :  { %826 = vst [vmem:[#allocation10] sm:$0xff] %v823_v58 }
 0x1ea   :  { %837 = dma.vmem_to_hbm [thread:$0]  %s833_s25, 128, %s835_s28, [#allocation4]  }
 0x1ee   :  { %v824_v59 = vpop.f32.mrf.mxu0 }
 0x1ef   :  { %1342 = dma.done.wait [#allocation4], 128  }
 0x1f0   :  { %1343 = vsyncadd [#allocation4], 4294967168 }
 0x1f1   :  { %842 = vsyncpa [#allocation3], 1 }
 0x1f2   :  { %843 = vsyncpa [#allocation6], 1 }
 0x1f3   :  { %844 = vsyncpa [#allocation9], 1 }
 0x1f4   :  { %845 = vsyncpa [#allocation4], 1 }

</bundles_post_ra>
